<compile_context>
chip_gen: v7x
topology: tpu7x:2x2x1
jax: 0.10.0
libtpu: 0.0.40
codegen_flags: <defaults>
</compile_context>

<pallas_src>
from functools import partial

import jax
import jax.numpy as jnp
from jax.experimental import pallas as pl
from jax.experimental.pallas import tpu as pltpu

MAX_SLIP = 0.4
MAX_GUESS = 0.4

LANE_QUANTUM = 512                     # lane-tile granularity
MAX_TILE = 32768                       # target lanes per grid step
FUSED_VMEM_BUDGET = 20 * 1024 * 1024   # per-step VMEM budget for the fused path
VMEM_LIMIT_BYTES = 32 * 1024 * 1024    # explicit scoped-VMEM limit
_TINY = float(jnp.finfo(jnp.float32).tiny)


# --------------------------------------------------------------------------- #
# Kernels
# --------------------------------------------------------------------------- #
def _emit_output(miss, sg_ref, out_ref):
    """Shared tail: miss -> n = 0.5**miss -> (1-slip)^n * guess^(1-n)."""
    n = jnp.exp2(-miss)                                      # exact powers of two
    slip = MAX_SLIP / (1.0 + jnp.exp(-sg_ref[0:1, :]))       # sigmoid * max_slip
    guess = MAX_GUESS / (1.0 + jnp.exp(-sg_ref[1:2, :]))     # sigmoid * max_guess
    # guard log(0) when sigmoid underflows; result is then ~0 (n<1) or 1 (n==1)
    guess = jnp.maximum(guess, _TINY)
    out_ref[...] = jnp.exp(n * jnp.log(1.0 - slip) + (1.0 - n) * jnp.log(guess))


def dina_fused_kernel(qtab_ref, theta_ref, qid_ref, uid_ref, sg_ref, out_ref):
    """Embedding gather fused in-kernel via one-hot matmuls on the MXU.

    qtab_ref : (K, Q_pad) bf16, Q-table transposed (VMEM-resident)
    theta_ref: (K, U_pad) bf16, theta table transposed (VMEM-resident)
    qid_ref  : (1, Bt) int32, uid_ref: (1, Bt) int32
    sg_ref   : (2, Bt) f32  (row 0 = slip logits, row 1 = guess logits)
    """
    num_q = qtab_ref.shape[1]
    num_u = theta_ref.shape[1]
    bt = qid_ref.shape[1]

    onehot_q = (jax.lax.broadcasted_iota(jnp.int32, (num_q, bt), 0)
                == qid_ref[...]).astype(jnp.bfloat16)                 # (Qp, Bt)
    onehot_u = (jax.lax.broadcasted_iota(jnp.int32, (num_u, bt), 0)
                == uid_ref[...]).astype(jnp.bfloat16)                 # (Up, Bt)

    concept = jnp.dot(qtab_ref[...], onehot_q,
                      preferred_element_type=jnp.float32)             # (K, Bt) {0,1}
    theta = jnp.dot(theta_ref[...], onehot_u,
                    preferred_element_type=jnp.float32)               # (K, Bt)

    unmastered = (theta <= 0.0).astype(jnp.float32)                   # 1 - STE(theta)
    miss = jnp.sum(concept * unmastered, axis=0, keepdims=True)       # (1, Bt)
    _emit_output(miss, sg_ref, out_ref)


def dina_gathered_kernel(concept_ref, theta_ref, sg_ref, out_ref):
    """Fallback: concept/theta pre-gathered (bf16, transposed) in XLA glue."""
    concept = concept_ref[...].astype(jnp.float32)                    # (K, Bt) {0,1}
    unmastered = (theta_ref[...] <= 0).astype(jnp.float32)            # 1 - STE(theta)
    miss = jnp.sum(concept * unmastered, axis=0, keepdims=True)       # (1, Bt)
    _emit_output(miss, sg_ref, out_ref)


# --------------------------------------------------------------------------- #
# Tiling / planning helpers (all static-shape Python, runs at trace time)
# --------------------------------------------------------------------------- #
def _round_up(x, m):
    return pl.cdiv(x, m) * m


def _plan_batch(batch, max_tile):
    """Pick (lane_tile, n_steps, padded_batch) for the 1-D batch grid."""
    units = max(1, pl.cdiv(batch, LANE_QUANTUM))
    max_units = max(1, max_tile // LANE_QUANTUM)
    if units <= max_units:
        n_steps, tile_units = 1, units
    else:
        n_steps = pl.cdiv(units, max_units)
        if n_steps % 2:
            n_steps += 1              # even step count: balanced on v7x's 2 TCs
        tile_units = pl.cdiv(units, n_steps)
    tile = tile_units * LANE_QUANTUM
    return tile, n_steps, tile * n_steps


def _fused_max_tile(num_concept, q_pad, u_pad):
    """Largest lane tile whose per-step VMEM footprint fits the fused budget."""
    table_bytes = 2 * num_concept * (q_pad + u_pad) * 2     # double-buffered bf16 tables
    per_lane = 8 * (q_pad + u_pad)                          # iota(i32)+mask+one-hot(bf16)
    per_lane += 8 * num_concept                             # gathered concept/theta f32
    per_lane += 96                                          # ids/sg/out buffers + slack
    avail = FUSED_VMEM_BUDGET - table_bytes
    if avail < per_lane * LANE_QUANTUM:
        return 0
    return min(MAX_TILE, (avail // per_lane) // LANE_QUANTUM * LANE_QUANTUM)


# --------------------------------------------------------------------------- #
# Forward pass
# --------------------------------------------------------------------------- #
@partial(jax.jit, static_argnames=("use_fused", "max_tile"))
def dina_forward(theta_emb, slip_emb, guess_emb, q_table, user_id, question_id,
                 use_fused=True, max_tile=MAX_TILE):
    batch = user_id.shape[0]
    num_user, num_concept = theta_emb.shape
    num_question = q_table.shape[0]

    q_pad = _round_up(num_question, 128)
    u_pad = _round_up(num_user, 128)

    fused_cap = _fused_max_tile(num_concept, q_pad, u_pad) if use_fused else 0
    fused = fused_cap >= LANE_QUANTUM
    cap = max(min(max_tile, fused_cap) if fused else max_tile, LANE_QUANTUM)

    tile, n_steps, b_pad = _plan_batch(batch, cap)
    pad = b_pad - batch

    qid = jnp.pad(question_id.astype(jnp.int32), (0, pad))   # pad with valid index 0
    uid = jnp.pad(user_id.astype(jnp.int32), (0, pad))

    # slip/guess logits packed into one lane-dense (2, B_pad) slab (single gather)
    sg_table = jnp.concatenate([slip_emb, guess_emb], axis=1).astype(jnp.float32).T
    sg = jnp.take(sg_table, qid, axis=1)                     # (2, B_pad) f32

    grid = (n_steps,)
    out_shape = jax.ShapeDtypeStruct((1, b_pad), jnp.float32)
    out_spec = pl.BlockSpec((1, tile), lambda i: (0, i))
    params = pltpu.CompilerParams(dimension_semantics=("parallel",),
                                  vmem_limit_bytes=VMEM_LIMIT_BYTES)

    if fused:
        # Tables stay VMEM-resident (constant index_map); only ids/logits/output
        # stream per grid step (~20 B per batch element of HBM traffic).
        q_tab_t = jnp.pad(q_table.astype(jnp.bfloat16).T,
                          ((0, 0), (0, q_pad - num_question)))        # (K, Qp)
        theta_t = jnp.pad(theta_emb.astype(jnp.bfloat16).T,
                          ((0, 0), (0, u_pad - num_user)))            # (K, Up)
        cost = pl.CostEstimate(
            flops=int(b_pad * (2 * num_concept * (q_pad + u_pad) + 4 * num_concept + 16)),
            transcendentals=int(6 * b_pad),
            bytes_accessed=int(2 * num_concept * (q_pad + u_pad) + b_pad * 20),
        )
        out = pl.pallas_call(
            dina_fused_kernel,
            out_shape=out_shape,
            grid=grid,
            in_specs=[
                pl.BlockSpec((num_concept, q_pad), lambda i: (0, 0)),  # Q-table^T
                pl.BlockSpec((num_concept, u_pad), lambda i: (0, 0)),  # theta^T
                pl.BlockSpec((1, tile), lambda i: (0, i)),             # question ids
                pl.BlockSpec((1, tile), lambda i: (0, i)),             # user ids
                pl.BlockSpec((2, tile), lambda i: (0, i)),             # slip/guess logits
            ],
            out_specs=out_spec,
            compiler_params=params,
            cost_estimate=cost,
        )(q_tab_t, theta_t, qid.reshape(1, b_pad), uid.reshape(1, b_pad), sg)
    else:
        # Fallback (tables too large for VMEM): relayout-free glue gather — pad is
        # folded into the index vector and the tables are pre-transposed, so the
        # (K, B_pad) bf16 slabs are produced by a single gather each.
        concept_t = jnp.take(q_table.astype(jnp.bfloat16).T, qid, axis=1)    # (K, B_pad)
        theta_g_t = jnp.take(theta_emb.astype(jnp.bfloat16).T, uid, axis=1)  # (K, B_pad)
        cost = pl.CostEstimate(
            flops=int(b_pad * (4 * num_concept + 16)),
            transcendentals=int(6 * b_pad),
            bytes_accessed=int(b_pad * (4 * num_concept + 12)),
        )
        out = pl.pallas_call(
            dina_gathered_kernel,
            out_shape=out_shape,
            grid=grid,
            in_specs=[
                pl.BlockSpec((num_concept, tile), lambda i: (0, i)),
                pl.BlockSpec((num_concept, tile), lambda i: (0, i)),
                pl.BlockSpec((2, tile), lambda i: (0, i)),
            ],
            out_specs=out_spec,
            compiler_params=params,
            cost_estimate=cost,
        )(concept_t, theta_g_t, sg)

    return out[0, :batch]                                    # (B,)


# --------------------------------------------------------------------------- #
# Pure-JAX reference (mirrors the PyTorch use_ste=True branch)
# --------------------------------------------------------------------------- #
def dina_forward_ref(theta_emb, slip_emb, guess_emb, q_table, user_id, question_id):
    concept = q_table[question_id].astype(jnp.float32)
    slip = jnp.squeeze(jax.nn.sigmoid(slip_emb[question_id]) * MAX_SLIP, axis=-1)
    guess = jnp.squeeze(jax.nn.sigmoid(guess_emb[question_id]) * MAX_GUESS, axis=-1)
    theta = (theta_emb[user_id] > 0.0).astype(jnp.float32)
    mask_theta = (concept == 0.0).astype(jnp.float32) + \
                 (concept == 1.0).astype(jnp.float32) * theta
    n = jnp.prod((mask_theta + 1.0) / 2.0, axis=-1)
    return jnp.power(1.0 - slip, n) * jnp.power(guess, 1.0 - n)


def _run_case(key, num_user, num_question, num_concept, batch, **kwargs):
    k_theta, k_slip, k_guess, k_q, k_uid, k_qid = jax.random.split(key, 6)

    theta_emb = jax.random.normal(k_theta, (num_user, num_concept), jnp.float32)
    slip_emb = jax.random.normal(k_slip, (num_question, 1), jnp.float32)
    guess_emb = jax.random.normal(k_guess, (num_question, 1), jnp.float32)
    q_table = (jax.random.uniform(k_q, (num_question, num_concept)) > 0.5
               ).astype(jnp.float32)
    user_id = jax.random.randint(k_uid, (batch,), 0, num_user)
    question_id = jax.random.randint(k_qid, (batch,), 0, num_question)

    out = dina_forward(theta_emb, slip_emb, guess_emb, q_table,
                       user_id, question_id, **kwargs)
    out = jax.block_until_ready(out)
    ref = dina_forward_ref(theta_emb, slip_emb, guess_emb, q_table,
                           user_id, question_id)
    assert out.shape == (batch,)
    assert jnp.allclose(out, ref, atol=1e-5, rtol=1e-5), (out, ref)


if __name__ == "__main__":
    key = jax.random.PRNGKey(0)
    k0, k1, k2, k3 = jax.random.split(key, 4)

    # small shapes consistent with the module (fused gather path)
    _run_case(k0, num_user=16, num_question=20, num_concept=8, batch=8)
    # lane-padding path, fused gather
    _run_case(k1, num_user=64, num_question=40, num_concept=8, batch=1029)
    # fallback path (glue gather, bf16 transposed tables)
    _run_case(k2, num_user=64, num_question=40, num_concept=8, batch=1029,
              use_fused=False)
    # multi-step grid with even step-count rounding (v7x dual-TC balance)
    _run_case(k3, num_user=32, num_question=24, num_concept=8, batch=1029,
              max_tile=512)

    # TODO(synk): the non-STE training branch (temperature-annealed softmax mix)
    # depends on a Python-side step counter; only the use_ste=True path is kerneled.
    print("KERNEL_OK")
</pallas_src>

<mosaic_0001>
module attributes {stable_mosaic.version = 11 : i64} {
  func.func @dina_fused_kernel(%arg0: i32, %arg1: memref<8x128xbf16, #tpu.memory_space<vmem>>, %arg2: memref<8x128xbf16, #tpu.memory_space<vmem>>, %arg3: memref<1x512xi32, #tpu.memory_space<vmem>>, %arg4: memref<1x512xi32, #tpu.memory_space<vmem>>, %arg5: memref<2x512xf32, #tpu.memory_space<vmem>>, %arg6: memref<1x512xf32, #tpu.memory_space<vmem>>) attributes {dimension_semantics = [#tpu.dimension_semantics<parallel>], iteration_bounds = array<i64: 1>, scalar_prefetch = 0 : i64, scratch_operands = 0 : i64, tpu.core_type = #tpu.core_type<tc>, window_params = [{pipeline_mode = #tpu.pipeline_mode<synchronous>, transform_indices = @transform_0, window_bounds = array<i64: 8, 128>}, {pipeline_mode = #tpu.pipeline_mode<synchronous>, transform_indices = @transform_1, window_bounds = array<i64: 8, 128>}, {transform_indices = @transform_2, window_bounds = array<i64: 1, 512>}, {transform_indices = @transform_3, window_bounds = array<i64: 1, 512>}, {transform_indices = @transform_4, window_bounds = array<i64: 2, 512>}, {transform_indices = @transform_5, window_bounds = array<i64: 1, 512>}]} {
    %0 = tpu.iota {dimensions = array<i32: 0>} : vector<128x512xi32>
    %c0 = arith.constant 0 : index
    %c0_0 = arith.constant 0 : index
    %1 = vector.load %arg3[%c0, %c0_0] : memref<1x512xi32, #tpu.memory_space<vmem>>, vector<1x512xi32>
    %2 = vector.broadcast %1 : vector<1x512xi32> to vector<128x512xi32>
    %3 = arith.cmpi eq, %0, %2 : vector<128x512xi32>
    %4 = arith.extui %3 : vector<128x512xi1> to vector<128x512xi32>
    %5 = arith.sitofp %4 : vector<128x512xi32> to vector<128x512xf32>
    %6 = arith.truncf %5 : vector<128x512xf32> to vector<128x512xbf16>
    %7 = tpu.iota {dimensions = array<i32: 0>} : vector<128x512xi32>
    %c0_1 = arith.constant 0 : index
    %c0_2 = arith.constant 0 : index
    %8 = vector.load %arg4[%c0_1, %c0_2] : memref<1x512xi32, #tpu.memory_space<vmem>>, vector<1x512xi32>
    %9 = vector.broadcast %8 : vector<1x512xi32> to vector<128x512xi32>
    %10 = arith.cmpi eq, %7, %9 : vector<128x512xi32>
    %11 = arith.extui %10 : vector<128x512xi1> to vector<128x512xi32>
    %12 = arith.sitofp %11 : vector<128x512xi32> to vector<128x512xf32>
    %13 = arith.truncf %12 : vector<128x512xf32> to vector<128x512xbf16>
    %c0_3 = arith.constant 0 : index
    %c0_4 = arith.constant 0 : index
    %14 = vector.load %arg1[%c0_3, %c0_4] : memref<8x128xbf16, #tpu.memory_space<vmem>>, vector<8x128xbf16>
    %cst = arith.constant dense<0.000000e+00> : vector<8x512xf32>
    %15 = tpu.matmul %14, %6, %cst {dimension_numbers = #tpu.dot_dimension_numbers<[1], [0], [0], [1], [0, 0, 1, 1], [], []>} : vector<8x128xbf16>, vector<128x512xbf16>, vector<8x512xf32> -> vector<8x512xf32>
    %c0_5 = arith.constant 0 : index
    %c0_6 = arith.constant 0 : index
    %16 = vector.load %arg2[%c0_5, %c0_6] : memref<8x128xbf16, #tpu.memory_space<vmem>>, vector<8x128xbf16>
    %cst_7 = arith.constant dense<0.000000e+00> : vector<8x512xf32>
    %17 = tpu.matmul %16, %13, %cst_7 {dimension_numbers = #tpu.dot_dimension_numbers<[1], [0], [0], [1], [0, 0, 1, 1], [], []>} : vector<8x128xbf16>, vector<128x512xbf16>, vector<8x512xf32> -> vector<8x512xf32>
    %cst_8 = arith.constant 0.000000e+00 : f32
    %18 = vector.broadcast %cst_8 : f32 to vector<8x512xf32>
    %19 = arith.cmpf ole, %17, %18 : vector<8x512xf32>
    %20 = arith.extui %19 : vector<8x512xi1> to vector<8x512xi32>
    %21 = arith.sitofp %20 : vector<8x512xi32> to vector<8x512xf32>
    %22 = arith.mulf %15, %21 : vector<8x512xf32>
    %cst_9 = arith.constant dense<0.000000e+00> : vector<512xf32>
    %23 = vector.multi_reduction <add>, %22, %cst_9 [0] : vector<8x512xf32> to vector<512xf32>
    %24 = vector.shape_cast %23 : vector<512xf32> to vector<1x512xf32>
    %cst_10 = arith.constant 0.000000e+00 : f32
    %25 = vector.broadcast %cst_10 : f32 to vector<1x512xf32>
    %26 = arith.subf %25, %24 : vector<1x512xf32>
    %27 = math.exp2 %26 : vector<1x512xf32>
    %c0_11 = arith.constant 0 : index
    %c0_12 = arith.constant 0 : index
    %28 = vector.load %arg5[%c0_11, %c0_12] : memref<2x512xf32, #tpu.memory_space<vmem>>, vector<1x512xf32>
    %cst_13 = arith.constant 0.000000e+00 : f32
    %29 = vector.broadcast %cst_13 : f32 to vector<1x512xf32>
    %30 = arith.subf %29, %28 : vector<1x512xf32>
    %31 = math.exp %30 : vector<1x512xf32>
    %cst_14 = arith.constant 1.000000e+00 : f32
    %32 = vector.broadcast %cst_14 : f32 to vector<1x512xf32>
    %33 = arith.addf %32, %31 : vector<1x512xf32>
    %cst_15 = arith.constant 4.000000e-01 : f32
    %34 = vector.broadcast %cst_15 : f32 to vector<1x512xf32>
    %35 = arith.divf %34, %33 : vector<1x512xf32>
    %c1 = arith.constant 1 : index
    %c0_16 = arith.constant 0 : index
    %36 = vector.load %arg5[%c1, %c0_16] : memref<2x512xf32, #tpu.memory_space<vmem>>, vector<1x512xf32>
    %cst_17 = arith.constant 0.000000e+00 : f32
    %37 = vector.broadcast %cst_17 : f32 to vector<1x512xf32>
    %38 = arith.subf %37, %36 : vector<1x512xf32>
    %39 = math.exp %38 : vector<1x512xf32>
    %cst_18 = arith.constant 1.000000e+00 : f32
    %40 = vector.broadcast %cst_18 : f32 to vector<1x512xf32>
    %41 = arith.addf %40, %39 : vector<1x512xf32>
    %cst_19 = arith.constant 4.000000e-01 : f32
    %42 = vector.broadcast %cst_19 : f32 to vector<1x512xf32>
    %43 = arith.divf %42, %41 : vector<1x512xf32>
    %cst_20 = arith.constant 1.17549435E-38 : f32
    %44 = vector.broadcast %cst_20 : f32 to vector<1x512xf32>
    %45 = arith.maximumf %43, %44 : vector<1x512xf32>
    %cst_21 = arith.constant 1.000000e+00 : f32
    %46 = vector.broadcast %cst_21 : f32 to vector<1x512xf32>
    %47 = arith.subf %46, %35 : vector<1x512xf32>
    %48 = math.log %47 : vector<1x512xf32>
    %49 = arith.mulf %27, %48 : vector<1x512xf32>
    %cst_22 = arith.constant 1.000000e+00 : f32
    %50 = vector.broadcast %cst_22 : f32 to vector<1x512xf32>
    %51 = arith.subf %50, %27 : vector<1x512xf32>
    %52 = math.log %45 : vector<1x512xf32>
    %53 = arith.mulf %51, %52 : vector<1x512xf32>
    %54 = arith.addf %49, %53 : vector<1x512xf32>
    %55 = math.exp %54 : vector<1x512xf32>
    %c0_23 = arith.constant 0 : index
    %c0_24 = arith.constant 0 : index
    %56 = vector.load %arg6[%c0_23, %c0_24] : memref<1x512xf32, #tpu.memory_space<vmem>>, vector<1x512xf32>
    tpu.vector_store %arg6[%c0_23, %c0_24], %55 {strides = array<i32>} : memref<1x512xf32, #tpu.memory_space<vmem>>, vector<1x512xf32>,
    return
  }
  func.func @transform_0(%arg0: i32) -> (i32, i32) {
    %c0_i32 = arith.constant 0 : i32
    %c0_i32_0 = arith.constant 0 : i32
    %c0_i32_1 = arith.constant 0 : i32
    return %c0_i32, %c0_i32_0 : i32, i32
  }
  func.func @transform_1(%arg0: i32) -> (i32, i32) {
    %c0_i32 = arith.constant 0 : i32
    %c0_i32_0 = arith.constant 0 : i32
    %c0_i32_1 = arith.constant 0 : i32
    return %c0_i32, %c0_i32_0 : i32, i32
  }
  func.func @transform_2(%arg0: i32) -> (i32, i32) {
    %c0_i32 = arith.constant 0 : i32
    %c0_i32_0 = arith.constant 0 : i32
    return %c0_i32, %arg0 : i32, i32
  }
  func.func @transform_3(%arg0: i32) -> (i32, i32) {
    %c0_i32 = arith.constant 0 : i32
    %c0_i32_0 = arith.constant 0 : i32
    return %c0_i32, %arg0 : i32, i32
  }
  func.func @transform_4(%arg0: i32) -> (i32, i32) {
    %c0_i32 = arith.constant 0 : i32
    %c0_i32_0 = arith.constant 0 : i32
    return %c0_i32, %arg0 : i32, i32
  }
  func.func @transform_5(%arg0: i32) -> (i32, i32) {
    %c0_i32 = arith.constant 0 : i32
    %c0_i32_0 = arith.constant 0 : i32
    return %c0_i32, %arg0 : i32, i32
  }
}

</mosaic_0001>

<bundles_post_ra>
// kernel: dina_forward.1
= control target key start
LH: loop header
LB: loop body
LE: loop exit
PB: predicated region body
PF: predicated region fallthrough
CT: control target
= control target key end

     0   :  { %v21_v0 = vlaneseq  ;;  %v1152_v1 = vmov 0   ;;  %v1153_v15 = vmov 1.0|1.0   ;;  %v1154_v60 = vmov 0.0   ;;  %s1628_s2 = inlined_call_operand.vmem [shape: s32[1,512], index: 2, kind: input, shape index: {}]   ;;  %s1629_s3 = inlined_call_operand.vmem [shape: s32[1,512], index: 3, kind: input, shape index: {}]   ;;  %s1630_s0 = inlined_call_operand.vmem [shape: bf16[8,128], index: 0, kind: input, shape index: {}]   ;;  %s1631_s1 = inlined_call_operand.vmem [shape: bf16[8,128], index: 1, kind: input, shape index: {}]   ;;  %s1632_s4 = inlined_call_operand.vmem [shape: f32[2,512], index: 4, kind: input, shape index: {}]   ;;  %s1633_s5 = inlined_call_operand.vmem [shape: f32[1,512], index: 5, kind: output, shape index: {}]  }
   0x1   :  { %553 = vmatprep.mubr.bf16.mxu0 %v1152_v1  ;;  %594 = vmatprep.mubr.bf16.mxu1 %v1152_v1  ;;  %v38_v3 = vld [vmem:[%s1628_s2] sm:$0xf] }
   0x2   :  { %v1189_v2 = vshrl.u32 %v21_v0, 7  ;;  %v279_v28 = vld [vmem:[%s1629_s3] sm:$0xf] }
   0x3   :  { %v520_v33 = vld [vmem:[%s1630_s0] sm:$0xf] }
   0x4   :  { %v1195_v4 = vadd.s32 8, %v1189_v2  ;;  %v1198_v5 = vsub.s32 1, %v1189_v2  ;;  %v1201_v6 = vsub.s32 3, %v1189_v2  ;;  %v1204_v7 = vsub.s32 0, %v1189_v2  ;;  %v603_v34 = vld [vmem:[%s1631_s1] sm:$0xf] }
   0x5   :  { %v1207_v8 = vsub.s32 2, %v1189_v2  ;;  %v1210_v9 = vadd.s32 16, %v1189_v2  ;;  %v1222_v13 = vadd.s32 24, %v1189_v2  ;;  %v1249_v16 = vadd.s32 32, %v1189_v2 }
   0x6   :  { %v1213_v10 = vrot.slane %v38_v3, %v1198_v5  ;;  %v1216_v11 = vrot.slane %v38_v3, %v1201_v6  ;;  %v1219_v12 = vrot.slane %v38_v3, %v1204_v7  ;;  %v1252_v17 = vadd.s32 40, %v1189_v2  ;;  %v734_v35 = vld [vmem:[%s1632_s4] ss:$2 sm:$0xf] }
   0x7   :  { %v1225_v14 = vrot.slane %v38_v3, %v1207_v8  ;;  %v1275_v18 = vadd.s32 48, %v1189_v2  ;;  %v1278_v19 = vadd.s32 56, %v1189_v2  ;;  %v1301_v20 = vadd.s32 64, %v1189_v2  ;;  %v1119_v36 = vld [vmem:[%s1632_s4 + $0x1] ss:$2 sm:$0xf] }
   0x8   :  { %vm56_vm0 = vcmp.eq.s32.totalorder %v1189_v2, %v1213_v10  ;;  %vm60_vm1 = vcmp.eq.s32.totalorder %v1195_v4, %v1213_v10  ;;  %vm58_vm2 = vcmp.eq.s32.totalorder %v1189_v2, %v1216_v11  ;;  %vm62_vm3 = vcmp.eq.s32.totalorder %v1195_v4, %v1216_v11 }
   0x9   :  { %vm987_vm4 = vmpackc.low %vm60_vm1, %vm56_vm0  ;;  %vm55_vm5 = vcmp.eq.s32.totalorder %v1189_v2, %v1219_v12  ;;  %vm59_vm6 = vcmp.eq.s32.totalorder %v1195_v4, %v1219_v12  ;;  %vm57_vm7 = vcmp.eq.s32.totalorder %v1189_v2, %v1225_v14  ;;  %vm61_vm8 = vcmp.eq.s32.totalorder %v1195_v4, %v1225_v14 }
   0xa   :  { %988 = vmatprep.subr.msk.bf16.mxu0 %vm987_vm4, %v1153_v15  ;;  %vm1019_vm9 = vmpackc.low %vm62_vm3, %vm58_vm2  ;;  %vm64_vm10 = vcmp.eq.s32.totalorder %v1210_v9, %v1213_v10  ;;  %vm68_vm11 = vcmp.eq.s32.totalorder %v1222_v13, %v1213_v10  ;;  %vm66_vm13 = vcmp.eq.s32.totalorder %v1210_v9, %v1216_v11  ;;  %vm70_vm14 = vcmp.eq.s32.totalorder %v1222_v13, %v1216_v11 }
   0xb   :  { %1020 = vmatprep.subr.msk.bf16.mxu1 %vm1019_vm9, %v1153_v15  ;;  %vm989_vm12 = vmpackc.low %vm59_vm6, %vm55_vm5  ;;  %vm63_vm0 = vcmp.eq.s32.totalorder %v1210_v9, %v1219_v12  ;;  %vm67_vm1 = vcmp.eq.s32.totalorder %v1222_v13, %v1219_v12  ;;  %vm65_vm3 = vcmp.eq.s32.totalorder %v1210_v9, %v1225_v14  ;;  %vm69_vm4 = vcmp.eq.s32.totalorder %v1222_v13, %v1225_v14 }
   0xc   :  { %990 = vmatpush1.bf16.msk.msra.mxu0 %vm989_vm12, %v1153_v15  ;;  %vm1021_vm15 = vmpackc.low %vm61_vm8, %vm57_vm7  ;;  %vm72_vm6 = vcmp.eq.s32.totalorder %v1249_v16, %v1213_v10  ;;  %vm76_vm7 = vcmp.eq.s32.totalorder %v1252_v17, %v1213_v10  ;;  %vm74_vm9 = vcmp.eq.s32.totalorder %v1249_v16, %v1216_v11  ;;  %vm71_vm12 = vcmp.eq.s32.totalorder %v1249_v16, %v1219_v12 }
   0xd   :  { %1022 = vmatpush1.bf16.msk.msra.mxu1 %vm1021_vm15, %v1153_v15  ;;  %vm991_vm2 = vmpackc.low %vm68_vm11, %vm64_vm10  ;;  %vm78_vm10 = vcmp.eq.s32.totalorder %v1252_v17, %v1216_v11  ;;  %vm73_vm15 = vcmp.eq.s32.totalorder %v1249_v16, %v1225_v14  ;;  %v1304_v21 = vadd.s32 72, %v1189_v2  ;;  %v1327_v22 = vadd.s32 80, %v1189_v2 }
   0xe   :  { %992 = vmatprep.subr.msk.bf16.mxu0 %vm991_vm2, %v1153_v15  ;;  %vm1023_vm5 = vmpackc.low %vm70_vm14, %vm66_vm13  ;;  %vm75_vm13 = vcmp.eq.s32.totalorder %v1252_v17, %v1219_v12  ;;  %vm80_vm2 = vcmp.eq.s32.totalorder %v1275_v18, %v1213_v10  ;;  %v1330_v23 = vadd.s32 88, %v1189_v2  ;;  %v1353_v24 = vadd.s32 96, %v1189_v2 }
   0xf   :  { %1024 = vmatprep.subr.msk.bf16.mxu1 %vm1023_vm5, %v1153_v15  ;;  %vm993_vm8 = vmpackc.low %vm67_vm1, %vm63_vm0  ;;  %vm77_vm0 = vcmp.eq.s32.totalorder %v1252_v17, %v1225_v14  ;;  %vm82_vm5 = vcmp.eq.s32.totalorder %v1275_v18, %v1216_v11  ;;  %v1356_v25 = vadd.s32 104, %v1189_v2  ;;  %v1379_v26 = vadd.s32 112, %v1189_v2 }
  0x10   :  { %994 = vmatpush1.bf16.msk.msra.mxu0 %vm993_vm8, %v1153_v15  ;;  %vm1025_vm11 = vmpackc.low %vm69_vm4, %vm65_vm3  ;;  %vm84_vm3 = vcmp.eq.s32.totalorder %v1278_v19, %v1213_v10  ;;  %vm79_vm8 = vcmp.eq.s32.totalorder %v1275_v18, %v1219_v12  ;;  %v1382_v27 = vadd.s32 120, %v1189_v2  ;;  %v1408_v29 = vrot.slane %v279_v28, %v1198_v5 }
  0x11   :  { %1026 = vmatpush1.bf16.msk.msra.mxu1 %vm1025_vm11, %v1153_v15  ;;  %vm995_vm14 = vmpackc.low %vm76_vm7, %vm72_vm6  ;;  %vm86_vm6 = vcmp.eq.s32.totalorder %v1278_v19, %v1216_v11  ;;  %vm81_vm11 = vcmp.eq.s32.totalorder %v1275_v18, %v1225_v14  ;;  %v1416_v30 = vrot.slane %v279_v28, %v1201_v6  ;;  %v1424_v31 = vrot.slane %v279_v28, %v1204_v7 }
  0x12   :  { %996 = vmatprep.subr.msk.bf16.mxu0 %vm995_vm14, %v1153_v15  ;;  %vm1027_vm1 = vmpackc.low %vm78_vm10, %vm74_vm9  ;;  %vm83_vm9 = vcmp.eq.s32.totalorder %v1278_v19, %v1219_v12  ;;  %vm88_vm14 = vcmp.eq.s32.totalorder %v1301_v20, %v1213_v10  ;;  %v1432_v32 = vrot.slane %v279_v28, %v1207_v8  ;;  %v735_v37 = vsub.f32 0.0, %v734_v35 }
  0x13   :  { %1028 = vmatprep.subr.msk.bf16.mxu1 %vm1027_vm1, %v1153_v15  ;;  %vm997_vm4 = vmpackc.low %vm75_vm13, %vm71_vm12  ;;  %vm85_vm12 = vcmp.eq.s32.totalorder %v1278_v19, %v1225_v14  ;;  %vm90_vm1 = vcmp.eq.s32.totalorder %v1301_v20, %v1216_v11  ;;  %v743_v38 = vsub.f32 0.0, %v1119_v36 }
  0x14   :  { %998 = vmatpush1.bf16.msk.msra.mxu0 %vm997_vm4, %v1153_v15  ;;  %vm1029_vm7 = vmpackc.low %vm77_vm0, %vm73_vm15  ;;  %vm92_vm15 = vcmp.eq.s32.totalorder %v1304_v21, %v1213_v10  ;;  %vm87_vm4 = vcmp.eq.s32.totalorder %v1301_v20, %v1219_v12  ;;  %v736_v39 = vmul.f32 1.442695, %v735_v37 }
  0x15   :  { %1030 = vmatpush1.bf16.msk.msra.mxu1 %vm1029_vm7, %v1153_v15  ;;  %vm999_vm10 = vmpackc.low %vm84_vm3, %vm80_vm2  ;;  %vm94_vm2 = vcmp.eq.s32.totalorder %v1304_v21, %v1216_v11  ;;  %vm89_vm7 = vcmp.eq.s32.totalorder %v1301_v20, %v1225_v14  ;;  %v744_v40 = vmul.f32 1.442695, %v743_v38 }
  0x16   :  { %1000 = vmatprep.subr.msk.bf16.mxu0 %vm999_vm10, %v1153_v15  ;;  %vm1031_vm13 = vmpackc.low %vm86_vm6, %vm82_vm5  ;;  %vm91_vm5 = vcmp.eq.s32.totalorder %v1304_v21, %v1219_v12  ;;  %vm96_vm10 = vcmp.eq.s32.totalorder %v1327_v22, %v1213_v10  ;;  %1124 = vpow2.f32 %v736_v39 }
  0x17   :  { %1032 = vmatprep.subr.msk.bf16.mxu1 %vm1031_vm13, %v1153_v15  ;;  %vm1001_vm0 = vmpackc.low %vm83_vm9, %vm79_vm8  ;;  %vm93_vm8 = vcmp.eq.s32.totalorder %v1304_v21, %v1225_v14  ;;  %vm98_vm13 = vcmp.eq.s32.totalorder %v1327_v22, %v1216_v11  ;;  %1126 = vpow2.f32 %v744_v40 }
  0x18   :  { %1002 = vmatpush1.bf16.msk.msra.mxu0 %vm1001_vm0, %v1153_v15  ;;  %vm1033_vm3 = vmpackc.low %vm85_vm12, %vm81_vm11  ;;  %vm100_vm11 = vcmp.eq.s32.totalorder %v1330_v23, %v1213_v10  ;;  %vm95_vm0 = vcmp.eq.s32.totalorder %v1327_v22, %v1219_v12 }
  0x19   :  { %1034 = vmatpush1.bf16.msk.msra.mxu1 %vm1033_vm3, %v1153_v15  ;;  %vm1003_vm6 = vmpackc.low %vm92_vm15, %vm88_vm14  ;;  %vm102_vm14 = vcmp.eq.s32.totalorder %v1330_v23, %v1216_v11  ;;  %vm97_vm3 = vcmp.eq.s32.totalorder %v1327_v22, %v1225_v14 }
  0x1a   :  { %1004 = vmatprep.subr.msk.bf16.mxu0 %vm1003_vm6, %v1153_v15  ;;  %vm1035_vm9 = vmpackc.low %vm94_vm2, %vm90_vm1  ;;  %vm99_vm1 = vcmp.eq.s32.totalorder %v1330_v23, %v1219_v12  ;;  %vm104_vm6 = vcmp.eq.s32.totalorder %v1353_v24, %v1213_v10 }
  0x1b   :  { %1036 = vmatprep.subr.msk.bf16.mxu1 %vm1035_vm9, %v1153_v15  ;;  %vm1005_vm12 = vmpackc.low %vm91_vm5, %vm87_vm4  ;;  %vm101_vm4 = vcmp.eq.s32.totalorder %v1330_v23, %v1225_v14  ;;  %vm106_vm9 = vcmp.eq.s32.totalorder %v1353_v24, %v1216_v11 }
  0x1c   :  { %1006 = vmatpush1.bf16.msk.msra.mxu0 %vm1005_vm12, %v1153_v15  ;;  %vm1037_vm15 = vmpackc.low %vm93_vm8, %vm89_vm7  ;;  %vm108_vm7 = vcmp.eq.s32.totalorder %v1356_v25, %v1213_v10  ;;  %vm103_vm12 = vcmp.eq.s32.totalorder %v1353_v24, %v1219_v12 }
  0x1d   :  { %1038 = vmatpush1.bf16.msk.msra.mxu1 %vm1037_vm15, %v1153_v15  ;;  %vm1007_vm2 = vmpackc.low %vm100_vm11, %vm96_vm10  ;;  %vm110_vm10 = vcmp.eq.s32.totalorder %v1356_v25, %v1216_v11  ;;  %vm105_vm15 = vcmp.eq.s32.totalorder %v1353_v24, %v1225_v14 }
  0x1e   :  { %1008 = vmatprep.subr.msk.bf16.mxu0 %vm1007_vm2, %v1153_v15  ;;  %vm1039_vm5 = vmpackc.low %vm102_vm14, %vm98_vm13  ;;  %vm107_vm13 = vcmp.eq.s32.totalorder %v1356_v25, %v1219_v12  ;;  %vm112_vm2 = vcmp.eq.s32.totalorder %v1379_v26, %v1213_v10 }
  0x1f   :  { %1040 = vmatprep.subr.msk.bf16.mxu1 %vm1039_vm5, %v1153_v15  ;;  %vm1009_vm8 = vmpackc.low %vm99_vm1, %vm95_vm0  ;;  %vm109_vm0 = vcmp.eq.s32.totalorder %v1356_v25, %v1225_v14  ;;  %vm114_vm5 = vcmp.eq.s32.totalorder %v1379_v26, %v1216_v11 }
  0x20   :  { %1010 = vmatpush1.bf16.msk.msra.mxu0 %vm1009_vm8, %v1153_v15  ;;  %vm1041_vm11 = vmpackc.low %vm101_vm4, %vm97_vm3  ;;  %vm116_vm3 = vcmp.eq.s32.totalorder %v1382_v27, %v1213_v10  ;;  %vm111_vm8 = vcmp.eq.s32.totalorder %v1379_v26, %v1219_v12  ;;  %v1125_v49 = vpop.eup %1124 }
  0x21   :  { %1042 = vmatpush1.bf16.msk.msra.mxu1 %vm1041_vm11, %v1153_v15  ;;  %vm1011_vm14 = vmpackc.low %vm108_vm7, %vm104_vm6  ;;  %vm118_vm6 = vcmp.eq.s32.totalorder %v1382_v27, %v1216_v11  ;;  %vm113_vm11 = vcmp.eq.s32.totalorder %v1379_v26, %v1225_v14  ;;  %v1127_v50 = vpop.eup %1126  ;;  %v738_v51 = vadd.f32 1.0, %v1125_v49 }
  0x22   :  { %1012 = vmatprep.subr.msk.bf16.mxu0 %vm1011_vm14, %v1153_v15  ;;  %vm1043_vm1 = vmpackc.low %vm110_vm10, %vm106_vm9  ;;  %vm115_vm9 = vcmp.eq.s32.totalorder %v1382_v27, %v1219_v12  ;;  %vm297_vm14 = vcmp.eq.s32.totalorder %v1189_v2, %v1408_v29  ;;  %v746_v52 = vadd.f32 1.0, %v1127_v50 }
  0x23   :  { %1044 = vmatprep.subr.msk.bf16.mxu1 %vm1043_vm1, %v1153_v15  ;;  %vm1013_vm4 = vmpackc.low %vm107_vm13, %vm103_vm12  ;;  %vm117_vm12 = vcmp.eq.s32.totalorder %v1382_v27, %v1225_v14  ;;  %vm299_vm1 = vcmp.eq.s32.totalorder %v1189_v2, %v1416_v30  ;;  %1128 = vrcp.f32 %v738_v51 }
  0x24   :  { %1014 = vmatpush1.bf16.msk.msra.mxu0 %vm1013_vm4, %v1153_v15  ;;  %vm1045_vm7 = vmpackc.low %vm109_vm0, %vm105_vm15  ;;  %vm301_vm15 = vcmp.eq.s32.totalorder %v1195_v4, %v1408_v29  ;;  %vm296_vm4 = vcmp.eq.s32.totalorder %v1189_v2, %v1424_v31  ;;  %1130 = vrcp.f32 %v746_v52 }
  0x25   :  { %1046 = vmatpush1.bf16.msk.msra.mxu1 %vm1045_vm7, %v1153_v15  ;;  %vm1015_vm10 = vmpackc.low %vm116_vm3, %vm112_vm2  ;;  %vm303_vm2 = vcmp.eq.s32.totalorder %v1195_v4, %v1416_v30  ;;  %vm298_vm7 = vcmp.eq.s32.totalorder %v1189_v2, %v1432_v32 }
  0x26   :  { %1016 = vmatprep.subr.msk.bf16.mxu0 %vm1015_vm10, %v1153_v15  ;;  %vm1047_vm13 = vmpackc.low %vm118_vm6, %vm114_vm5  ;;  %vm300_vm5 = vcmp.eq.s32.totalorder %v1195_v4, %v1424_v31  ;;  %vm305_vm10 = vcmp.eq.s32.totalorder %v1210_v9, %v1408_v29 }
  0x27   :  { %1048 = vmatprep.subr.msk.bf16.mxu1 %vm1047_vm13, %v1153_v15  ;;  %vm1017_vm0 = vmpackc.low %vm115_vm9, %vm111_vm8  ;;  %vm302_vm8 = vcmp.eq.s32.totalorder %v1195_v4, %v1432_v32  ;;  %vm307_vm13 = vcmp.eq.s32.totalorder %v1210_v9, %v1416_v30 }
  0x28   :  { %1018 = vmatpush1.bf16.msk.msra.mxu0 %vm1017_vm0, %v1153_v15  ;;  %vm1049_vm3 = vmpackc.low %vm117_vm12, %vm113_vm11  ;;  %vm309_vm11 = vcmp.eq.s32.totalorder %v1222_v13, %v1408_v29  ;;  %vm304_vm0 = vcmp.eq.s32.totalorder %v1210_v9, %v1424_v31 }
  0x29   :  { %1050 = vmatpush1.bf16.msk.msra.mxu1 %vm1049_vm3, %v1153_v15  ;;  %vm1051_vm6 = vmpackc.low %vm301_vm15, %vm297_vm14  ;;  %vm311_vm14 = vcmp.eq.s32.totalorder %v1222_v13, %v1416_v30  ;;  %vm306_vm3 = vcmp.eq.s32.totalorder %v1210_v9, %v1432_v32 }
  0x2a   :  { %1052 = vmatprep.subr.msk.bf16.mxu0 %vm1051_vm6, %v1153_v15  ;;  %vm1083_vm9 = vmpackc.low %vm303_vm2, %vm299_vm1  ;;  %vm308_vm1 = vcmp.eq.s32.totalorder %v1222_v13, %v1424_v31  ;;  %vm313_vm6 = vcmp.eq.s32.totalorder %v1249_v16, %v1408_v29 }
  0x2b   :  { %554 = vmatmul.mubr.bf16.vlgmr.msra.gmra.mrb[0].mxu0 %v520_v33  ;;  %1084 = vmatprep.subr.msk.bf16.mxu1 %vm1083_vm9, %v1153_v15  ;;  %vm1053_vm12 = vmpackc.low %vm300_vm5, %vm296_vm4  ;;  %vm310_vm4 = vcmp.eq.s32.totalorder %v1222_v13, %v1432_v32  ;;  %vm315_vm9 = vcmp.eq.s32.totalorder %v1249_v16, %v1416_v30 }
  0x2c   :  { %595 = vmatmul.mubr.bf16.vlgmr.msra.gmra.mrb[0].mxu1 %v520_v33  ;;  %1054 = vmatpush1.bf16.msk.msra.mxu0 %vm1053_vm12, %v1153_v15  ;;  %vm1085_vm15 = vmpackc.low %vm302_vm8, %vm298_vm7  ;;  %vm317_vm7 = vcmp.eq.s32.totalorder %v1252_v17, %v1408_v29  ;;  %vm312_vm12 = vcmp.eq.s32.totalorder %v1249_v16, %v1424_v31 }
  0x2d   :  { %1086 = vmatpush1.bf16.msk.msra.mxu1 %vm1085_vm15, %v1153_v15  ;;  %vm1055_vm2 = vmpackc.low %vm309_vm11, %vm305_vm10  ;;  %636 = vmatprep.mubr.bf16.mxu0 %v1152_v1  ;;  %vm319_vm10 = vcmp.eq.s32.totalorder %v1252_v17, %v1416_v30  ;;  %vm314_vm15 = vcmp.eq.s32.totalorder %v1249_v16, %v1432_v32  ;;  %v1129_v53 = vpop.eup %1128 }
  0x2e   :  { %1056 = vmatprep.subr.msk.bf16.mxu0 %vm1055_vm2, %v1153_v15  ;;  %vm1087_vm5 = vmpackc.low %vm311_vm14, %vm307_vm13  ;;  %677 = vmatprep.mubr.bf16.mxu1 %v1152_v1  ;;  %vm316_vm13 = vcmp.eq.s32.totalorder %v1252_v17, %v1424_v31  ;;  %vm321_vm2 = vcmp.eq.s32.totalorder %v1275_v18, %v1408_v29  ;;  %v1131_v54 = vpop.eup %1130  ;;  %v740_v56 = vmul.f32 0.4, %v1129_v53 }
  0x2f   :  { %1088 = vmatprep.subr.msk.bf16.mxu1 %vm1087_vm5, %v1153_v15  ;;  %vm1057_vm8 = vmpackc.low %vm308_vm1, %vm304_vm0  ;;  %vm318_vm0 = vcmp.eq.s32.totalorder %v1252_v17, %v1432_v32  ;;  %vm323_vm5 = vcmp.eq.s32.totalorder %v1275_v18, %v1416_v30  ;;  %v748_v57 = vmul.f32 0.4, %v1131_v54 }
  0x30   :  { %1058 = vmatpush1.bf16.msk.msra.mxu0 %vm1057_vm8, %v1153_v15  ;;  %vm1089_vm11 = vmpackc.low %vm310_vm4, %vm306_vm3  ;;  %vm325_vm3 = vcmp.eq.s32.totalorder %v1278_v19, %v1408_v29  ;;  %vm320_vm8 = vcmp.eq.s32.totalorder %v1275_v18, %v1424_v31  ;;  %v750_v17 = vsub.f32 1.0, %v740_v56 }
  0x31   :  { %1090 = vmatpush1.bf16.msk.msra.mxu1 %vm1089_vm11, %v1153_v15  ;;  %vm1059_vm14 = vmpackc.low %vm317_vm7, %vm313_vm6  ;;  %vm327_vm6 = vcmp.eq.s32.totalorder %v1278_v19, %v1416_v30  ;;  %vm322_vm11 = vcmp.eq.s32.totalorder %v1275_v18, %v1432_v32 }
  0x32   :  { %1060 = vmatprep.subr.msk.bf16.mxu0 %vm1059_vm14, %v1153_v15  ;;  %vm1091_vm1 = vmpackc.low %vm319_vm10, %vm315_vm9  ;;  %vm324_vm9 = vcmp.eq.s32.totalorder %v1278_v19, %v1424_v31  ;;  %vm329_vm14 = vcmp.eq.s32.totalorder %v1301_v20, %v1408_v29  ;;  %1132 = vlog2.f32 %v750_v17 }
  0x33   :  { %1092 = vmatprep.subr.msk.bf16.mxu1 %vm1091_vm1, %v1153_v15  ;;  %vm1061_vm4 = vmpackc.low %vm316_vm13, %vm312_vm12  ;;  %vm326_vm12 = vcmp.eq.s32.totalorder %v1278_v19, %v1432_v32  ;;  %vm331_vm1 = vcmp.eq.s32.totalorder %v1301_v20, %v1416_v30 }
  0x34   :  { %1062 = vmatpush1.bf16.msk.msra.mxu0 %vm1061_vm4, %v1153_v15  ;;  %vm1093_vm7 = vmpackc.low %vm318_vm0, %vm314_vm15  ;;  %vm333_vm15 = vcmp.eq.s32.totalorder %v1304_v21, %v1408_v29  ;;  %vm328_vm4 = vcmp.eq.s32.totalorder %v1301_v20, %v1424_v31 }
  0x35   :  { %1094 = vmatpush1.bf16.msk.msra.mxu1 %vm1093_vm7, %v1153_v15  ;;  %vm1063_vm10 = vmpackc.low %vm325_vm3, %vm321_vm2  ;;  %vm335_vm2 = vcmp.eq.s32.totalorder %v1304_v21, %v1416_v30  ;;  %vm330_vm7 = vcmp.eq.s32.totalorder %v1301_v20, %v1432_v32 }
  0x36   :  { %1064 = vmatprep.subr.msk.bf16.mxu0 %vm1063_vm10, %v1153_v15  ;;  %vm1095_vm13 = vmpackc.low %vm327_vm6, %vm323_vm5  ;;  %vm332_vm5 = vcmp.eq.s32.totalorder %v1304_v21, %v1424_v31  ;;  %vm337_vm10 = vcmp.eq.s32.totalorder %v1327_v22, %v1408_v29 }
  0x37   :  { %1096 = vmatprep.subr.msk.bf16.mxu1 %vm1095_vm13, %v1153_v15  ;;  %vm1065_vm0 = vmpackc.low %vm324_vm9, %vm320_vm8  ;;  %vm334_vm8 = vcmp.eq.s32.totalorder %v1304_v21, %v1432_v32  ;;  %vm339_vm13 = vcmp.eq.s32.totalorder %v1327_v22, %v1416_v30  ;;  %v749_v21 = vmax.f32 %v748_v57, 1.1754944e-38 }
  0x38   :  { %1066 = vmatpush1.bf16.msk.msra.mxu0 %vm1065_vm0, %v1153_v15  ;;  %vm1097_vm3 = vmpackc.low %vm326_vm12, %vm322_vm11  ;;  %vm341_vm11 = vcmp.eq.s32.totalorder %v1330_v23, %v1408_v29  ;;  %vm336_vm0 = vcmp.eq.s32.totalorder %v1327_v22, %v1424_v31 }
  0x39   :  { %1098 = vmatpush1.bf16.msk.msra.mxu1 %vm1097_vm3, %v1153_v15  ;;  %vm1067_vm6 = vmpackc.low %vm333_vm15, %vm329_vm14  ;;  %vm343_vm14 = vcmp.eq.s32.totalorder %v1330_v23, %v1416_v30  ;;  %vm338_vm3 = vcmp.eq.s32.totalorder %v1327_v22, %v1432_v32  ;;  %1134 = vlog2.f32 %v749_v21 }
  0x3a   :  { %1068 = vmatprep.subr.msk.bf16.mxu0 %vm1067_vm6, %v1153_v15  ;;  %vm1099_vm9 = vmpackc.low %vm335_vm2, %vm331_vm1  ;;  %vm340_vm1 = vcmp.eq.s32.totalorder %v1330_v23, %v1424_v31  ;;  %vm345_vm6 = vcmp.eq.s32.totalorder %v1353_v24, %v1408_v29 }
  0x3b   :  { %1100 = vmatprep.subr.msk.bf16.mxu1 %vm1099_vm9, %v1153_v15  ;;  %vm1069_vm12 = vmpackc.low %vm332_vm5, %vm328_vm4  ;;  %vm342_vm4 = vcmp.eq.s32.totalorder %v1330_v23, %v1432_v32  ;;  %vm347_vm9 = vcmp.eq.s32.totalorder %v1353_v24, %v1416_v30 }
  0x3c   :  { %1070 = vmatpush1.bf16.msk.msra.mxu0 %vm1069_vm12, %v1153_v15  ;;  %vm1101_vm15 = vmpackc.low %vm334_vm8, %vm330_vm7  ;;  %vm349_vm7 = vcmp.eq.s32.totalorder %v1356_v25, %v1408_v29  ;;  %vm344_vm12 = vcmp.eq.s32.totalorder %v1353_v24, %v1424_v31 }
  0x3d   :  { %1102 = vmatpush1.bf16.msk.msra.mxu1 %vm1101_vm15, %v1153_v15  ;;  %vm1071_vm2 = vmpackc.low %vm341_vm11, %vm337_vm10  ;;  %vm351_vm10 = vcmp.eq.s32.totalorder %v1356_v25, %v1416_v30  ;;  %vm346_vm15 = vcmp.eq.s32.totalorder %v1353_v24, %v1432_v32 }
  0x3e   :  { %1072 = vmatprep.subr.msk.bf16.mxu0 %vm1071_vm2, %v1153_v15  ;;  %vm1103_vm5 = vmpackc.low %vm343_vm14, %vm339_vm13  ;;  %vm348_vm13 = vcmp.eq.s32.totalorder %v1356_v25, %v1424_v31  ;;  %vm353_vm2 = vcmp.eq.s32.totalorder %v1379_v26, %v1408_v29 }
  0x3f   :  { %1104 = vmatprep.subr.msk.bf16.mxu1 %vm1103_vm5, %v1153_v15  ;;  %vm1073_vm8 = vmpackc.low %vm340_vm1, %vm336_vm0  ;;  %vm350_vm0 = vcmp.eq.s32.totalorder %v1356_v25, %v1432_v32  ;;  %vm355_vm5 = vcmp.eq.s32.totalorder %v1379_v26, %v1416_v30 }
  0x40   :  { %1074 = vmatpush1.bf16.msk.msra.mxu0 %vm1073_vm8, %v1153_v15  ;;  %vm1105_vm11 = vmpackc.low %vm342_vm4, %vm338_vm3  ;;  %vm357_vm3 = vcmp.eq.s32.totalorder %v1382_v27, %v1408_v29  ;;  %vm352_vm8 = vcmp.eq.s32.totalorder %v1379_v26, %v1424_v31 }
  0x41   :  { %1106 = vmatpush1.bf16.msk.msra.mxu1 %vm1105_vm11, %v1153_v15  ;;  %vm1075_vm14 = vmpackc.low %vm349_vm7, %vm345_vm6  ;;  %vm359_vm6 = vcmp.eq.s32.totalorder %v1382_v27, %v1416_v30  ;;  %vm354_vm11 = vcmp.eq.s32.totalorder %v1379_v26, %v1432_v32 }
  0x42   :  { %1076 = vmatprep.subr.msk.bf16.mxu0 %vm1075_vm14, %v1153_v15  ;;  %vm1107_vm1 = vmpackc.low %vm351_vm10, %vm347_vm9  ;;  %vm356_vm9 = vcmp.eq.s32.totalorder %v1382_v27, %v1424_v31 }
  0x43   :  { %1108 = vmatprep.subr.msk.bf16.mxu1 %vm1107_vm1, %v1153_v15  ;;  %vm1077_vm4 = vmpackc.low %vm348_vm13, %vm344_vm12  ;;  %vm358_vm12 = vcmp.eq.s32.totalorder %v1382_v27, %v1432_v32 }
  0x44   :  { %1078 = vmatpush1.bf16.msk.msra.mxu0 %vm1077_vm4, %v1153_v15  ;;  %vm1109_vm7 = vmpackc.low %vm350_vm0, %vm346_vm15  ;;  %vm852_vm4 = vcmp.lt.s32.totalorder %v21_v0, 512 }
  0x45   :  { %1110 = vmatpush1.bf16.msk.msra.mxu1 %vm1109_vm7, %v1153_v15  ;;  %vm1079_vm10 = vmpackc.low %vm357_vm3, %vm353_vm2 }
  0x46   :  { %1080 = vmatprep.subr.msk.bf16.mxu0 %vm1079_vm10, %v1153_v15  ;;  %vm1111_vm13 = vmpackc.low %vm359_vm6, %vm355_vm5 }
  0x47   :  { %1112 = vmatprep.subr.msk.bf16.mxu1 %vm1111_vm13, %v1153_v15  ;;  %vm1081_vm14 = vmpackc.low %vm356_vm9, %vm352_vm8 }
  0x48   :  { %1082 = vmatpush1.bf16.msk.msra.mxu0 %vm1081_vm14, %v1153_v15  ;;  %vm1113_vm15 = vmpackc.low %vm358_vm12, %vm354_vm11 }
  0x49   :  { %1114 = vmatpush1.bf16.msk.msra.mxu1 %vm1113_vm15, %v1153_v15 }
  0x4b   :  { %637 = vmatmul.mubr.bf16.vlgmr.msra.gmra.mrb[4].mxu0 %v603_v34 }
  0x4c   :  { %678 = vmatmul.mubr.bf16.vlgmr.msra.gmra.mrb[4].mxu1 %v603_v34 }
  0xfe   :  { %v555_v41 = vpop.f32.mrb[0].mxu0 }
  0xff   :  { %v596_v42 = vpop.f32.mrb[0].mxu1  ;;  %v557_v43 = vpop.f32.mrb[1].mxu0 }
 0x100   :  { %v598_v44 = vpop.f32.mrb[1].mxu1  ;;  %v559_v45 = vpop.f32.mrb[2].mxu0 }
 0x101   :  { %v600_v46 = vpop.f32.mrb[2].mxu1  ;;  %v560_v47 = vpop.f32.mrb[3].mxu0 }
 0x102   :  { %v601_v48 = vpop.f32.mrb[3].mxu1  ;;  %v1133_v46 = vpop.eup %1132 }
 0x103   :  { %v1135_v47 = vpop.eup %1134  ;;  %v752_v48 = vmul.f32 0.6931472, %v1133_v46 }
 0x104   :  { %v783_v49 = vmul.f32 0.6931472, %v1135_v47 }
 0x105   :  { %v757_v50 = vrot.slane %v752_v48, %v1204_v7  ;;  %v765_v53 = vrot.slane %v752_v48, %v1207_v8  ;;  %v761_v57 = vrot.slane %v752_v48, %v1198_v5 }
 0x106   :  { %v788_v51 = vrot.slane %v783_v49, %v1204_v7  ;;  %v796_v54 = vrot.slane %v783_v49, %v1207_v8 }
 0x11e   :  { %v638_v55 = vpop.f32.mrb[4].mxu0 }
 0x11f   :  { %vm686_vm0 = vcmp.le.f32.partialorder %v638_v55, 0.0  ;;  %v679_v58 = vpop.f32.mrb[4].mxu1  ;;  %v640_v59 = vpop.f32.mrb[5].mxu0 }
 0x120   :  { %v1115_v61 = vsel %vm686_vm0, 1.0, %v1154_v60  ;;  %vm688_vm1 = vcmp.le.f32.partialorder %v679_v58, 0.0  ;;  %vm687_vm2 = vcmp.le.f32.partialorder %v640_v59, 0.0  ;;  %v681_v62 = vpop.f32.mrb[5].mxu1  ;;  %v642_v63 = vpop.f32.mrb[6].mxu0  ;;  %v792_v58 = vrot.slane %v783_v49, %v1198_v5 }
 0x121   :  { %v698_v1 = vmul.f32 %v1115_v61, %v555_v41  ;;  %v1117_v3 = vsel %vm688_vm1, 1.0, %v1154_v60  ;;  %v1116_v4 = vsel %vm687_vm2, 1.0, %v1154_v60  ;;  %vm689_vm3 = vcmp.le.f32.partialorder %v681_v62, 0.0  ;;  %v683_v9 = vpop.f32.mrb[6].mxu1  ;;  %v643_v10 = vpop.f32.mrb[7].mxu0 }
 0x122   :  { %v700_v11 = vmul.f32 %v1117_v3, %v596_v42  ;;  %v699_v12 = vmul.f32 %v1116_v4, %v557_v43  ;;  %v1118_v13 = vsel %vm689_vm3, 1.0, %v1154_v60  ;;  %v684_v14 = vpop.f32.mrb[7].mxu1  ;;  %v769_v61 = vrot.slane %v752_v48, %v1201_v6 }
 0x123   :  { %v702_v15 = vrot.slane %v698_v1, 4  ;;  %v701_v16 = vmul.f32 %v1118_v13, %v598_v44  ;;  %v800_v62 = vrot.slane %v783_v49, %v1201_v6 }
 0x124   :  { %v714_v18 = vrot.slane %v700_v11, 4  ;;  %v708_v19 = vrot.slane %v699_v12, 4 }
 0x125   :  { %v703_v20 = vadd.f32 %v702_v15, %v698_v1  ;;  %v720_v22 = vrot.slane %v701_v16, 4 }
 0x126   :  { %v715_v23 = vadd.f32 %v714_v18, %v700_v11  ;;  %v709_v24 = vadd.f32 %v708_v19, %v699_v12 }
 0x127   :  { %v704_v25 = vrot.slane %v703_v20, 2  ;;  %v721_v26 = vadd.f32 %v720_v22, %v701_v16 }
 0x128   :  { %v716_v27 = vrot.slane %v715_v23, 2  ;;  %v710_v28 = vrot.slane %v709_v24, 2 }
 0x129   :  { %v705_v29 = vadd.f32 %v704_v25, %v703_v20  ;;  %v722_v30 = vrot.slane %v721_v26, 2  ;;  %v1155_v20 = vmov 1966171168  }
 0x12a   :  { %v717_v31 = vadd.f32 %v716_v27, %v715_v23  ;;  %v711_v32 = vadd.f32 %v710_v28, %v709_v24  ;;  %v828_v21 = vunpack.c.l.s4 %v1155_v20 }
 0x12b   :  { %v706_v33 = vrot.slane %v705_v29, 1  ;;  %v723_v34 = vadd.f32 %v722_v30, %v721_v26 }
 0x12c   :  { %v718_v35 = vrot.slane %v717_v31, 1  ;;  %v712_v36 = vrot.slane %v711_v32, 1  ;;  %v829_v22 = vunpack.c.0.s8 %v828_v21 }
 0x12d   :  { %v707_v37 = vadd.f32 %v706_v33, %v705_v29  ;;  %v724_v38 = vrot.slane %v723_v34, 1 }
 0x12e   :  { %v719_v39 = vadd.f32 %v718_v35, %v717_v31  ;;  %v713_v40 = vadd.f32 %v712_v36, %v711_v32  ;;  %v832_v25 = vsub.s32 %v829_v22, %v1189_v2 }
 0x12f   :  { %v726_v41 = vsub.f32 0.0, %v707_v37  ;;  %v725_v42 = vadd.f32 %v724_v38, %v723_v34 }
 0x130   :  { %v728_v43 = vsub.f32 0.0, %v719_v39  ;;  %v727_v44 = vsub.f32 0.0, %v713_v40 }
 0x131   :  { %1136 = vpow2.f32 %v726_v41  ;;  %v729_v45 = vsub.f32 0.0, %v725_v42 }
 0x132   :  { %1138 = vpow2.f32 %v728_v43 }
 0x133   :  { %1140 = vpow2.f32 %v727_v44 }
 0x134   :  { %1142 = vpow2.f32 %v729_v45 }
 0x13b   :  { %v1137_v52 = vpop.eup %1136 }
 0x13c   :  { %v1139_v55 = vpop.eup %1138  ;;  %v778_v56 = vsub.f32 1.0, %v1137_v52  ;;  %v774_v1 = vmul.f32 %v1137_v52, %v757_v50 }
 0x13d   :  { %v1141_v59 = vpop.eup %1140  ;;  %v780_v60 = vsub.f32 1.0, %v1139_v55  ;;  %v776_v4 = vmul.f32 %v1139_v55, %v765_v53 }
 0x13e   :  { %v1143_v63 = vpop.eup %1142  ;;  %v805_v7 = vmul.f32 %v788_v51, %v778_v56  ;;  %v779_v3 = vsub.f32 1.0, %v1141_v59  ;;  %v775_v11 = vmul.f32 %v1141_v59, %v761_v57 }
 0x13f   :  { %v807_v9 = vmul.f32 %v796_v54, %v780_v60  ;;  %v781_v10 = vsub.f32 1.0, %v1143_v63  ;;  %v777_v14 = vmul.f32 %v1143_v63, %v769_v61 }
 0x140   :  { %v809_v8 = vadd.f32 %v805_v7, %v774_v1  ;;  %v806_v12 = vmul.f32 %v792_v58, %v779_v3 }
 0x141   :  { %v811_v13 = vadd.f32 %v807_v9, %v776_v4  ;;  %v808_v15 = vmul.f32 %v800_v62, %v781_v10 }
 0x142   :  { %v813_v5 = vmul.f32 1.442695, %v809_v8  ;;  %v810_v16 = vadd.f32 %v806_v12, %v775_v11 }
 0x143   :  { %v817_v17 = vmul.f32 1.442695, %v811_v13  ;;  %v812_v18 = vadd.f32 %v808_v15, %v777_v14 }
 0x144   :  { %1144 = vpow2.f32 %v813_v5  ;;  %v815_v19 = vmul.f32 1.442695, %v810_v16 }
 0x145   :  { %1146 = vpow2.f32 %v817_v17  ;;  %v819_v6 = vmul.f32 1.442695, %v812_v18 }
 0x146   :  { %1148 = vpow2.f32 %v815_v19 }
 0x147   :  { %1150 = vpow2.f32 %v819_v6 }
 0x14e   :  { %v1145_v23 = vpop.eup %1144 }
 0x14f   :  { %v1147_v24 = vpop.eup %1146 }
 0x150   :  { %v1149_v26 = vpop.eup %1148 }
 0x151   :  { %v1151_v27 = vpop.eup %1150  ;;  %v825_v28 = vcombine.low %v1145_v23, %v1149_v26 }
 0x152   :  { %v826_v29 = vcombine.low %v1147_v24, %v1151_v27 }
 0x153   :  { %v833_v30 = vrot.slane %v825_v28, %v832_v25 }
 0x154   :  { %v840_v31 = vrot.slane %v826_v29, %v832_v25 }
 0x156   :  { %v841_v32 = vcombine.low %v833_v30, %v840_v31 }
 0x158   :  { %v848_v33 = vrot.slane %v841_v32, %v832_v25 }
 0x15a   :  { %854 = vst.msk [vmem:[%s1633_s5] sm:$0xf] %vm852_vm4, %v848_v33 }

</bundles_post_ra>
